<compile_context>
chip_gen: v7x
topology: tpu7x:2x2x1
jax: 0.10.0
libtpu: 0.0.40
codegen_flags: <defaults>
</compile_context>

<pallas_src>
import math

import jax
import jax.numpy as jnp
from jax.experimental import pallas as pl
from jax.experimental.pallas import tpu as pltpu

_LANES = 128       # lane width of a vreg
_BLOCK_ROWS = 1024 # 1024 x 128 x 4B = 512 KiB per buffer -> fits every chip


def _copy_kernel(x_ref, o_ref):
    # Pure identity copy of one VMEM tile; the "selection" is static Python
    # in the wrapper (exactly as free as PyTorch's tuple indexing).
    o_ref[...] = x_ref[...]


def _identity_copy(x):
    """Tiled, lane-dense HBM->HBM copy of a single tensor via Pallas."""
    orig_shape = x.shape
    dtype = x.dtype
    total = math.prod(orig_shape) if orig_shape else 1

    # Present a lane-dense 2-D view: last dim = 128 whenever the element
    # count allows it (unmasked full-lane stores), otherwise fall back to
    # (prod(leading), last_dim) with a full-extent block (always legal).
    if total % _LANES == 0:
        rows, cols = total // _LANES, _LANES
    elif len(orig_shape) >= 2:
        rows, cols = math.prod(orig_shape[:-1]), orig_shape[-1]
    else:
        rows, cols = 1, total
    x2 = x.reshape(rows, cols)

    # Block rows: full extent for small inputs (always legal w.r.t. the
    # (8,128) rule), otherwise an 8-aligned 1024-row tile; a partial final
    # block is handled by Pallas (OOB reads padded, OOB writes dropped).
    tb = rows if rows <= _BLOCK_ROWS else _BLOCK_ROWS
    grid = (pl.cdiv(rows, tb),)

    out2 = pl.pallas_call(
        _copy_kernel,
        out_shape=jax.ShapeDtypeStruct((rows, cols), dtype),
        grid=grid,
        in_specs=[pl.BlockSpec((tb, cols), lambda i: (i, 0))],
        out_specs=pl.BlockSpec((tb, cols), lambda i: (i, 0)),
        compiler_params=pltpu.CompilerParams(
            # Independent row tiles -> shard across v7x's 2 TensorCores;
            # no-op on single-TC v5e/v6e.
            dimension_semantics=("parallel",),
        ),
    )(x2)
    return out2.reshape(orig_shape)


def select_item(inputs, item_index):
    """Pallas equivalent of SelectItem(item_index)(inputs).

    `item_index` is a static Python int (module hyper-parameter), so the
    selection is ordinary tuple indexing (zero HBM traffic, raises IndexError
    for out-of-range indices just like PyTorch).  Only the selected tensor is
    routed through the tiled identity-copy kernel; the other candidates are
    never read, so they may have arbitrary shapes/dtypes.
    """
    x = inputs[item_index]
    return _identity_copy(jnp.asarray(x))


if __name__ == "__main__":
    key = jax.random.PRNGKey(0)
    B, S, H = 2, 8, 32
    k0, k1, k2 = jax.random.split(key, 3)

    # LSTM-style candidate tuple: (output, h_n, c_n) with different shapes —
    # the previous stacked implementation could not handle this case.
    inputs = (
        jax.random.normal(k0, (B, S, H), dtype=jnp.float32),  # output
        jax.random.normal(k1, (1, B, H), dtype=jnp.float32),  # h_n
        jax.random.normal(k2, (1, B, H), dtype=jnp.float32),  # c_n
    )

    item_index = 0  # module hyper-parameter from __init__

    out = jax.block_until_ready(select_item(inputs, item_index))

    ref = inputs[item_index]
    assert out.shape == ref.shape and out.dtype == ref.dtype
    assert jnp.array_equal(out, ref), "mismatch vs reference selection"

    print("KERNEL_OK")
</pallas_src>

<mosaic_0001>
module attributes {stable_mosaic.version = 11 : i64} {
  func.func @_copy_kernel(%arg0: i32, %arg1: memref<4x128xf32, #tpu.memory_space<vmem>>, %arg2: memref<4x128xf32, #tpu.memory_space<vmem>>) attributes {dimension_semantics = [#tpu.dimension_semantics<parallel>], iteration_bounds = array<i64: 1>, scalar_prefetch = 0 : i64, scratch_operands = 0 : i64, tpu.core_type = #tpu.core_type<tc>, window_params = [{transform_indices = @transform_0, window_bounds = array<i64: 4, 128>}, {transform_indices = @transform_1, window_bounds = array<i64: 4, 128>}]} {
    %c0 = arith.constant 0 : index
    %c0_0 = arith.constant 0 : index
    %0 = vector.load %arg1[%c0, %c0_0] : memref<4x128xf32, #tpu.memory_space<vmem>>, vector<4x128xf32>
    %c0_1 = arith.constant 0 : index
    %c0_2 = arith.constant 0 : index
    %1 = vector.load %arg2[%c0_1, %c0_2] : memref<4x128xf32, #tpu.memory_space<vmem>>, vector<4x128xf32>
    tpu.vector_store %arg2[%c0_1, %c0_2], %0 {strides = array<i32>} : memref<4x128xf32, #tpu.memory_space<vmem>>, vector<4x128xf32>,
    return
  }
  func.func @transform_0(%arg0: i32) -> (i32, i32) {
    %c0_i32 = arith.constant 0 : i32
    %c0_i32_0 = arith.constant 0 : i32
    return %arg0, %c0_i32 : i32, i32
  }
  func.func @transform_1(%arg0: i32) -> (i32, i32) {
    %c0_i32 = arith.constant 0 : i32
    %c0_i32_0 = arith.constant 0 : i32
    return %arg0, %c0_i32 : i32, i32
  }
}

</mosaic_0001>

<bundles_post_ra>
// kernel: tpu_custom_call.1
= control target key start
LH: loop header
LB: loop body
LE: loop exit
PB: predicated region body
PF: predicated region fallthrough
CT: control target
= control target key end

     0   :  { %6 = vsyncpa [#allocation3], 0  ;;  %s124_s0 = inlined_call_operand.hbm [shape: f32[4,128], index: 0, kind: input, shape index: {}]   ;;  %s125_s1 = inlined_call_operand.hbm [shape: f32[4,128], index: 1, kind: output, shape index: {}]  }
   0x1   :  { %7 = vsyncpa [#allocation4], 0  ;;  %s88_s6 = smov [#allocation2]   ;;  %s40_s10 = scalar_lea.hbm %s124_s0, 64 }
   0x2   :  { %s14_s7 = sshll.u32 %s88_s6, 4  ;;  %p41_p0 = scmp.ne.s32.totalorder %s124_s0, %s40_s10  ;;  %s15_s7 = int_to_ptr.vmem [resolvable:$true] %s14_s7 }
   0x3   :  { %p44_p1 = scmp.lt.u32.totalorder %s40_s10, %s124_s0 }
   0x5   :  { %p46_p2 = pnand %p44_p1, %p41_p0 }
   0x7   :  { %49 = shalt.err (!%p46_p2)
}
   0x8   :  { %s50_s15 = scalar_lea.vmem %s15_s7, 64  ;;  %p55_p4 = scmp.lt.s32.totalorder %s15_s7, %s15_s7 }
   0x9   :  { %p51_p3 = scmp.ne.s32.totalorder %s15_s7, %s50_s15  ;;  %p56_p5 = scmp.lt.s32.totalorder %s50_s15, %s50_s15 }
   0xb   :  { %p57_p6 = por %p56_p5, %p55_p4 }
   0xd   :  { %p58_p7 = pnand %p57_p6, %p51_p3 }
   0xf   :  { %61 = shalt.err (!%p58_p7)
}
  0x10   :  { %17 = dma.hbm_to_vmem [thread:$0]  %s124_s0, 64, %s15_s7, [#allocation3]  }
  0x11   :  { %84 = dma.done.wait [#allocation3], 64  }
  0x12   :  { %85 = vsyncadd [#allocation3], 4294967232  ;;  %s89_s18 = smov [#allocation5]   ;;  %v21_v0 = vld [vmem:[#allocation2] sm:$0xf] }
  0x13   :  { %s29_s19 = sshll.u32 %s89_s18, 4  ;;  %22 = vst [vmem:[#allocation5] sm:$0xf] %v21_v0  ;;  %s30_s19 = int_to_ptr.vmem [resolvable:$true] %s29_s19 }
  0x14   :  { %s62_s20 = scalar_lea.vmem %s30_s19, 64  ;;  %p67_p9 = scmp.lt.s32.totalorder %s30_s19, %s30_s19 }
  0x15   :  { %p63_p8 = scmp.ne.s32.totalorder %s30_s19, %s62_s20  ;;  %p68_p10 = scmp.lt.s32.totalorder %s62_s20, %s62_s20 }
  0x17   :  { %p69_p11 = por %p68_p10, %p67_p9 }
  0x19   :  { %p70_p12 = pnand %p69_p11, %p63_p8 }
  0x1b   :  { %73 = shalt.err (!%p70_p12)
}
  0x1c   :  { %s74_s23 = scalar_lea.hbm %s125_s1, 64 }
  0x1d   :  { %p75_p13 = scmp.ne.s32.totalorder %s125_s1, %s74_s23  ;;  %p78_p0 = scmp.lt.u32.totalorder %s74_s23, %s125_s1 }
  0x1f   :  { %p80_p1 = pnand %p78_p0, %p75_p13 }
  0x21   :  { %83 = shalt.err (!%p80_p1)
}
  0x22   :  { %32 = dma.vmem_to_hbm [thread:$0]  %s30_s19, 64, %s125_s1, [#allocation4]  }
  0x23   :  { %86 = dma.done.wait [#allocation4], 64  }
  0x24   :  { %87 = vsyncadd [#allocation4], 4294967232 }
  0x25   :  { %36 = vsyncpa [#allocation3], 1 }
  0x26   :  { %37 = vsyncpa [#allocation4], 1 }

</bundles_post_ra>
